<compile_context>
chip_gen: v7x
topology: tpu7x:2x2x1
jax: 0.10.0
libtpu: 0.0.40
codegen_flags: <defaults>
</compile_context>

<pallas_src>
import jax
import jax.numpy as jnp
import numpy as np
from jax.experimental import pallas as pl
from jax.experimental.pallas import tpu as pltpu

_LANE = 128


def _round_up(n, m):
    return ((n + m - 1) // m) * m


def _disc_kernel(x_ref, lbl_ref, w1x_ref, w1l_ref, b1_ref, w2_ref, b2_ref,
                 w3_ref, b3_ref, o_ref):
    # Layer 1: fused concat as split-K matmul + bias + ReLU.  Activations are
    # cast to bf16 in-VMEM (no extra HBM pass); accumulation forced to f32.
    x = x_ref[...].astype(w1x_ref.dtype)
    lbl = lbl_ref[...].astype(w1l_ref.dtype)
    h1 = (jnp.dot(x, w1x_ref[...], preferred_element_type=jnp.float32)
          + jnp.dot(lbl, w1l_ref[...], preferred_element_type=jnp.float32)
          + b1_ref[...])
    h1 = jnp.maximum(h1, 0.0)

    # Layer 2: matmul + bias + ReLU (f32 accumulation).
    h2 = jnp.dot(h1.astype(w2_ref.dtype), w2_ref[...],
                 preferred_element_type=jnp.float32) + b2_ref[...]
    h2 = jnp.maximum(h2, 0.0)

    # Output layer: single logit column.  W3 is a (1, H_pad) f32 row, so this
    # is a VPU multiply + XLU lane-reduce (no padded MXU columns), then a
    # scalar bias from SMEM and a sigmoid over (TB, 1) only.
    logit = jnp.sum(h2 * w3_ref[...], axis=-1, keepdims=True) + b3_ref[0, 0]
    o_ref[...] = jax.nn.sigmoid(logit).astype(o_ref.dtype)


def discriminator_forward(x, label, params, *, tb=512, compute_dtype=jnp.bfloat16):
    """x: [B, input_dim], label: [B, label_dim] -> [B, 1] float32 probabilities.

    params = (w1, b1, w2, b2, w3, b3), weights in (in_features, out_features)
    layout, unpadded float32 (w1 covers the concatenated [x ; label] input).
    """
    w1, b1, w2, b2, w3, b3 = params
    B, Dx = x.shape
    Dl = label.shape[1]
    H = w1.shape[1]
    assert w1.shape[0] == Dx + Dl and w2.shape == (H, H) and w3.shape[0] == H

    # ---- pad the hidden dim to lane width (exact: padded rows/cols are 0) ----
    H_pad = _round_up(H, _LANE)

    # Split W1 so concat(x, label) can be fused in-kernel as split-K dots.
    w1x = jnp.zeros((Dx, H_pad), jnp.float32).at[:, :H].set(w1[:Dx]).astype(compute_dtype)
    w1l = jnp.zeros((Dl, H_pad), jnp.float32).at[:, :H].set(w1[Dx:]).astype(compute_dtype)
    b1_p = jnp.zeros((1, H_pad), jnp.float32).at[:, :H].set(b1.reshape(1, H))
    w2_p = jnp.zeros((H_pad, H_pad), jnp.float32).at[:H, :H].set(w2).astype(compute_dtype)
    b2_p = jnp.zeros((1, H_pad), jnp.float32).at[:, :H].set(b2.reshape(1, H))
    w3_row = jnp.zeros((1, H_pad), jnp.float32).at[:, :H].set(w3.reshape(1, H))  # f32 (VPU/XLU path)
    b3_s = jnp.asarray(b3, jnp.float32).reshape(1, 1)                            # scalar, lives in SMEM

    # ---- batch tiling: TB multiple of 16 (bf16 sublane packing); guarantee
    # >= 2 grid steps when the batch allows so the "parallel" axis can shard
    # across v7x's 2 TensorCores (v5e/v6e are single-TC, harmless there). ----
    TB = min(max(16, _round_up(tb, 16)), _round_up(B, 16))
    if _round_up(B, TB) // TB < 2 and B > 16:
        TB = _round_up((B + 1) // 2, 16)
    B_pad = _round_up(B, TB)
    grid = (B_pad // TB,)

    # Only the (at most TB-1) ragged tail rows get zero-padded; no whole-tensor
    # concat / cast pass in the wrapper.
    if B_pad != B:
        x = jnp.pad(x, ((0, B_pad - B), (0, 0)))
        label = jnp.pad(label, ((0, B_pad - B), (0, 0)))

    # Advisory cost estimate so XLA can schedule around the call.
    flops = 2 * B_pad * ((Dx + Dl) * H_pad + H_pad * H_pad + H_pad)
    bytes_accessed = (
        B_pad * (Dx + Dl) * 4                        # x, label streamed (f32)
        + ((Dx + Dl) * H_pad + H_pad * H_pad) * 2    # bf16 weights (VMEM-resident)
        + (3 * H_pad + 1) * 4                        # biases + w3 row (f32)
        + B_pad * 4                                  # output (f32, single lane)
    )
    cost = pl.CostEstimate(flops=flops, transcendentals=B_pad,
                           bytes_accessed=bytes_accessed)

    out = pl.pallas_call(
        _disc_kernel,
        out_shape=jax.ShapeDtypeStruct((B_pad, 1), jnp.float32),
        grid=grid,
        in_specs=[
            pl.BlockSpec((TB, Dx), lambda i: (i, 0)),        # x: streamed over batch
            pl.BlockSpec((TB, Dl), lambda i: (i, 0)),        # label: streamed over batch
            pl.BlockSpec((Dx, H_pad), lambda i: (0, 0)),     # weights/biases: VMEM-resident
            pl.BlockSpec((Dl, H_pad), lambda i: (0, 0)),
            pl.BlockSpec((1, H_pad), lambda i: (0, 0)),
            pl.BlockSpec((H_pad, H_pad), lambda i: (0, 0)),
            pl.BlockSpec((1, H_pad), lambda i: (0, 0)),
            pl.BlockSpec((1, H_pad), lambda i: (0, 0)),
            pl.BlockSpec(memory_space=pltpu.MemorySpace.SMEM),  # b3 scalar
        ],
        out_specs=pl.BlockSpec((TB, 1), lambda i: (i, 0)),
        compiler_params=pltpu.CompilerParams(
            dimension_semantics=("parallel",),
            vmem_limit_bytes=48 * 1024 * 1024,
        ),
        cost_estimate=cost,
    )(x, label, w1x, w1l, b1_p, w2_p, b2_p, w3_row, b3_s)

    return out[:B]


def init_params(key, input_dim, hidden_dim, label_dim):
    """Deterministic init mimicking nn.Linear default (uniform +/- 1/sqrt(fan_in)).
    Weights stored as (in_features, out_features), unpadded float32."""
    ks = jax.random.split(key, 6)

    def linear(kw, kb, fan_in, fan_out):
        bound = 1.0 / np.sqrt(fan_in)
        w = jax.random.uniform(kw, (fan_in, fan_out), jnp.float32, -bound, bound)
        b = jax.random.uniform(kb, (1, fan_out), jnp.float32, -bound, bound)
        return w, b

    w1, b1 = linear(ks[0], ks[1], input_dim + label_dim, hidden_dim)
    w2, b2 = linear(ks[2], ks[3], hidden_dim, hidden_dim)
    w3, b3 = linear(ks[4], ks[5], hidden_dim, 1)
    return (w1, b1, w2, b2, w3, b3)


def reference_forward(x, label, params):
    w1, b1, w2, b2, w3, b3 = params
    h = jnp.concatenate([x, label], axis=-1) @ w1 + b1
    h = jax.nn.relu(h)
    h = h @ w2 + b2
    h = jax.nn.relu(h)
    return jax.nn.sigmoid(h @ w3 + b3)


if __name__ == "__main__":
    batch, input_dim, hidden_dim, label_dim = 8, 16, 32, 8

    key = jax.random.PRNGKey(0)
    k_x, k_l, k_p = jax.random.split(key, 3)

    x = jax.random.normal(k_x, (batch, input_dim), jnp.float32)
    label = jax.random.normal(k_l, (batch, label_dim), jnp.float32)
    params = init_params(k_p, input_dim, hidden_dim, label_dim)

    out = discriminator_forward(x, label, params)
    out = jax.block_until_ready(out)

    ref = reference_forward(x, label, params)
    # bf16 MXU operands (f32 accumulation) -> loosened tolerance vs f32 reference.
    np.testing.assert_allclose(np.asarray(out), np.asarray(ref), rtol=2e-2, atol=2e-2)

    print("KERNEL_OK")
</pallas_src>

<mosaic_0001>
module attributes {stable_mosaic.version = 11 : i64} {
  func.func @_disc_kernel(%arg0: i32, %arg1: memref<16x16xf32, #tpu.memory_space<vmem>>, %arg2: memref<16x8xf32, #tpu.memory_space<vmem>>, %arg3: memref<16x128xbf16, #tpu.memory_space<vmem>>, %arg4: memref<8x128xbf16, #tpu.memory_space<vmem>>, %arg5: memref<1x128xf32, #tpu.memory_space<vmem>>, %arg6: memref<128x128xbf16, #tpu.memory_space<vmem>>, %arg7: memref<1x128xf32, #tpu.memory_space<vmem>>, %arg8: memref<1x128xf32, #tpu.memory_space<vmem>>, %arg9: memref<1x1xf32, #tpu.memory_space<smem>>, %arg10: memref<16x1xf32, #tpu.memory_space<vmem>>) attributes {dimension_semantics = [#tpu.dimension_semantics<parallel>], iteration_bounds = array<i64: 1>, scalar_prefetch = 0 : i64, scratch_operands = 0 : i64, tpu.core_type = #tpu.core_type<tc>, window_params = [{transform_indices = @transform_0, window_bounds = array<i64: 16, 16>}, {transform_indices = @transform_1, window_bounds = array<i64: 16, 8>}, {pipeline_mode = #tpu.pipeline_mode<synchronous>, transform_indices = @transform_2, window_bounds = array<i64: 16, 128>}, {pipeline_mode = #tpu.pipeline_mode<synchronous>, transform_indices = @transform_3, window_bounds = array<i64: 8, 128>}, {pipeline_mode = #tpu.pipeline_mode<synchronous>, transform_indices = @transform_4, window_bounds = array<i64: 1, 128>}, {pipeline_mode = #tpu.pipeline_mode<synchronous>, transform_indices = @transform_5, window_bounds = array<i64: 128, 128>}, {pipeline_mode = #tpu.pipeline_mode<synchronous>, transform_indices = @transform_6, window_bounds = array<i64: 1, 128>}, {pipeline_mode = #tpu.pipeline_mode<synchronous>, transform_indices = @transform_7, window_bounds = array<i64: 1, 128>}, {transform_indices = @transform_8, window_bounds = array<i64: 1, 1>}, {transform_indices = @transform_9, window_bounds = array<i64: 16, 1>}]} {
    %c0 = arith.constant 0 : index
    %c0_0 = arith.constant 0 : index
    %0 = vector.load %arg1[%c0, %c0_0] : memref<16x16xf32, #tpu.memory_space<vmem>>, vector<16x16xf32>
    %1 = arith.truncf %0 : vector<16x16xf32> to vector<16x16xbf16>
    %c0_1 = arith.constant 0 : index
    %c0_2 = arith.constant 0 : index
    %2 = vector.load %arg2[%c0_1, %c0_2] : memref<16x8xf32, #tpu.memory_space<vmem>>, vector<16x8xf32>
    %3 = arith.truncf %2 : vector<16x8xf32> to vector<16x8xbf16>
    %c0_3 = arith.constant 0 : index
    %c0_4 = arith.constant 0 : index
    %4 = vector.load %arg3[%c0_3, %c0_4] : memref<16x128xbf16, #tpu.memory_space<vmem>>, vector<16x128xbf16>
    %cst = arith.constant dense<0.000000e+00> : vector<16x128xf32>
    %5 = tpu.matmul %1, %4, %cst {dimension_numbers = #tpu.dot_dimension_numbers<[1], [0], [0], [1], [0, 0, 1, 1], [], []>} : vector<16x16xbf16>, vector<16x128xbf16>, vector<16x128xf32> -> vector<16x128xf32>
    %c0_5 = arith.constant 0 : index
    %c0_6 = arith.constant 0 : index
    %6 = vector.load %arg4[%c0_5, %c0_6] : memref<8x128xbf16, #tpu.memory_space<vmem>>, vector<8x128xbf16>
    %cst_7 = arith.constant dense<0.000000e+00> : vector<16x128xf32>
    %7 = tpu.matmul %3, %6, %cst_7 {dimension_numbers = #tpu.dot_dimension_numbers<[1], [0], [0], [1], [0, 0, 1, 1], [], []>} : vector<16x8xbf16>, vector<8x128xbf16>, vector<16x128xf32> -> vector<16x128xf32>
    %8 = arith.addf %5, %7 : vector<16x128xf32>
    %c0_8 = arith.constant 0 : index
    %c0_9 = arith.constant 0 : index
    %9 = vector.load %arg5[%c0_8, %c0_9] : memref<1x128xf32, #tpu.memory_space<vmem>>, vector<1x128xf32>
    %10 = vector.broadcast %9 : vector<1x128xf32> to vector<16x128xf32>
    %11 = arith.addf %8, %10 : vector<16x128xf32>
    %cst_10 = arith.constant 0.000000e+00 : f32
    %12 = vector.broadcast %cst_10 : f32 to vector<16x128xf32>
    %13 = arith.maximumf %11, %12 : vector<16x128xf32>
    %14 = arith.truncf %13 : vector<16x128xf32> to vector<16x128xbf16>
    %c0_11 = arith.constant 0 : index
    %c0_12 = arith.constant 0 : index
    %15 = vector.load %arg6[%c0_11, %c0_12] : memref<128x128xbf16, #tpu.memory_space<vmem>>, vector<128x128xbf16>
    %cst_13 = arith.constant dense<0.000000e+00> : vector<16x128xf32>
    %16 = tpu.matmul %14, %15, %cst_13 {dimension_numbers = #tpu.dot_dimension_numbers<[1], [0], [0], [1], [0, 0, 1, 1], [], []>} : vector<16x128xbf16>, vector<128x128xbf16>, vector<16x128xf32> -> vector<16x128xf32>
    %c0_14 = arith.constant 0 : index
    %c0_15 = arith.constant 0 : index
    %17 = vector.load %arg7[%c0_14, %c0_15] : memref<1x128xf32, #tpu.memory_space<vmem>>, vector<1x128xf32>
    %18 = vector.broadcast %17 : vector<1x128xf32> to vector<16x128xf32>
    %19 = arith.addf %16, %18 : vector<16x128xf32>
    %cst_16 = arith.constant 0.000000e+00 : f32
    %20 = vector.broadcast %cst_16 : f32 to vector<16x128xf32>
    %21 = arith.maximumf %19, %20 : vector<16x128xf32>
    %c0_17 = arith.constant 0 : index
    %c0_18 = arith.constant 0 : index
    %22 = vector.load %arg8[%c0_17, %c0_18] : memref<1x128xf32, #tpu.memory_space<vmem>>, vector<1x128xf32>
    %23 = vector.broadcast %22 : vector<1x128xf32> to vector<16x128xf32>
    %24 = arith.mulf %21, %23 : vector<16x128xf32>
    %cst_19 = arith.constant dense<0.000000e+00> : vector<16xf32>
    %25 = vector.multi_reduction <add>, %24, %cst_19 [1] : vector<16x128xf32> to vector<16xf32>
    %26 = vector.shape_cast %25 : vector<16xf32> to vector<16x1xf32>
    %c0_20 = arith.constant 0 : index
    %c0_21 = arith.constant 0 : index
    %27 = memref.load %arg9[%c0_20, %c0_21] : memref<1x1xf32, #tpu.memory_space<smem>>
    %28 = vector.broadcast %27 : f32 to vector<16x1xf32>
    %29 = arith.addf %26, %28 : vector<16x1xf32>
    %30 = arith.negf %29 : vector<16x1xf32>
    %31 = math.exp %30 : vector<16x1xf32>
    %cst_22 = arith.constant 1.000000e+00 : f32
    %32 = vector.broadcast %cst_22 : f32 to vector<16x1xf32>
    %33 = arith.addf %32, %31 : vector<16x1xf32>
    %34 = arith.divf %32, %33 : vector<16x1xf32>
    %c0_23 = arith.constant 0 : index
    %c0_24 = arith.constant 0 : index
    %35 = vector.load %arg10[%c0_23, %c0_24] : memref<16x1xf32, #tpu.memory_space<vmem>>, vector<16x1xf32>
    tpu.vector_store %arg10[%c0_23, %c0_24], %34 {strides = array<i32>} : memref<16x1xf32, #tpu.memory_space<vmem>>, vector<16x1xf32>,
    return
  }
  func.func @transform_0(%arg0: i32) -> (i32, i32) {
    %c0_i32 = arith.constant 0 : i32
    %c0_i32_0 = arith.constant 0 : i32
    return %arg0, %c0_i32 : i32, i32
  }
  func.func @transform_1(%arg0: i32) -> (i32, i32) {
    %c0_i32 = arith.constant 0 : i32
    %c0_i32_0 = arith.constant 0 : i32
    return %arg0, %c0_i32 : i32, i32
  }
  func.func @transform_2(%arg0: i32) -> (i32, i32) {
    %c0_i32 = arith.constant 0 : i32
    %c0_i32_0 = arith.constant 0 : i32
    %c0_i32_1 = arith.constant 0 : i32
    return %c0_i32, %c0_i32_0 : i32, i32
  }
  func.func @transform_3(%arg0: i32) -> (i32, i32) {
    %c0_i32 = arith.constant 0 : i32
    %c0_i32_0 = arith.constant 0 : i32
    %c0_i32_1 = arith.constant 0 : i32
    return %c0_i32, %c0_i32_0 : i32, i32
  }
  func.func @transform_4(%arg0: i32) -> (i32, i32) {
    %c0_i32 = arith.constant 0 : i32
    %c0_i32_0 = arith.constant 0 : i32
    %c0_i32_1 = arith.constant 0 : i32
    return %c0_i32, %c0_i32_0 : i32, i32
  }
  func.func @transform_5(%arg0: i32) -> (i32, i32) {
    %c0_i32 = arith.constant 0 : i32
    %c0_i32_0 = arith.constant 0 : i32
    %c0_i32_1 = arith.constant 0 : i32
    return %c0_i32, %c0_i32_0 : i32, i32
  }
  func.func @transform_6(%arg0: i32) -> (i32, i32) {
    %c0_i32 = arith.constant 0 : i32
    %c0_i32_0 = arith.constant 0 : i32
    %c0_i32_1 = arith.constant 0 : i32
    return %c0_i32, %c0_i32_0 : i32, i32
  }
  func.func @transform_7(%arg0: i32) -> (i32, i32) {
    %c0_i32 = arith.constant 0 : i32
    %c0_i32_0 = arith.constant 0 : i32
    %c0_i32_1 = arith.constant 0 : i32
    return %c0_i32, %c0_i32_0 : i32, i32
  }
  func.func @transform_8(%arg0: i32) -> (i32, i32) {
    %c0_i32 = arith.constant 0 : i32
    %c0_i32_0 = arith.constant 0 : i32
    %c0_i32_1 = arith.constant 0 : i32
    return %c0_i32, %c0_i32_0 : i32, i32
  }
  func.func @transform_9(%arg0: i32) -> (i32, i32) {
    %c0_i32 = arith.constant 0 : i32
    %c0_i32_0 = arith.constant 0 : i32
    return %arg0, %c0_i32 : i32, i32
  }
}

</mosaic_0001>

<bundles_post_ra>
// kernel: tpu_custom_call.1
= control target key start
LH: loop header
LB: loop body
LE: loop exit
PB: predicated region body
PF: predicated region fallthrough
CT: control target
= control target key end

     0   :  { %15 = vsyncpa [#allocation4], 0  ;;  %s427_s30 = smov [#allocation3]   ;;  %s533_s0 = inlined_call_operand.vmem [shape: f32[16,16], index: 0, kind: input, shape index: {}]   ;;  %s534_s1 = inlined_call_operand.vmem [shape: f32[16,8], index: 1, kind: input, shape index: {}]   ;;  %s535_s2 = inlined_call_operand.vmem [shape: bf16[16,128], index: 2, kind: input, shape index: {}]   ;;  %s536_s3 = inlined_call_operand.vmem [shape: bf16[8,128], index: 3, kind: input, shape index: {}]   ;;  %s537_s4 = inlined_call_operand.vmem [shape: f32[1,128], index: 4, kind: input, shape index: {}]   ;;  %s538_s5 = inlined_call_operand.hbm [shape: bf16[128,128], index: 5, kind: input, shape index: {}]   ;;  %s539_s6 = inlined_call_operand.vmem [shape: f32[1,128], index: 6, kind: input, shape index: {}]   ;;  %s540_s7 = inlined_call_operand.vmem [shape: f32[1,128], index: 7, kind: input, shape index: {}]   ;;  %s541_s8 = inlined_call_operand.<no memory space> [shape: f32[1,1], index: 8, kind: input, shape index: {}]   ;;  %s542_s9 = inlined_call_operand.vmem [shape: f32[16,1], index: 9, kind: output, shape index: {}]  }
   0x1   :  { %s31_s10 = sshll.u32 %s427_s30, 4  ;;  %s403_s13 = scalar_lea.hbm %s538_s5, 1024  ;;  %s32_s10 = int_to_ptr.vmem [resolvable:$true] %s31_s10 }
   0x2   :  { %p404_p0 = scmp.ne.s32.totalorder %s538_s5, %s403_s13  ;;  %p407_p1 = scmp.lt.u32.totalorder %s403_s13, %s538_s5 }
   0x4   :  { %p409_p2 = pnand %p407_p1, %p404_p0 }
   0x6   :  { %412 = shalt.err (!%p409_p2)
}
   0x7   :  { %s413_s18 = scalar_lea.vmem %s32_s10, 1024  ;;  %p418_p4 = scmp.lt.s32.totalorder %s32_s10, %s32_s10 }
   0x8   :  { %p414_p3 = scmp.ne.s32.totalorder %s32_s10, %s413_s18  ;;  %p419_p5 = scmp.lt.s32.totalorder %s413_s18, %s413_s18 }
   0xa   :  { %p420_p6 = por %p419_p5, %p418_p4 }
   0xc   :  { %p421_p7 = pnand %p420_p6, %p414_p3 }
   0xe   :  { %424 = shalt.err (!%p421_p7)
}
   0xf   :  { %s428_s19 = smov 64   ;;  %s429_s20 = smov 4  }
  0x10   :  { %37 = dma.hbm_to_vmem [thread:$0]  %s538_s5, 1024, %s32_s10, [#allocation4], %s428_s19, %s428_s19, %s429_s20  }
  0x11   :  { %425 = dma.done.wait [#allocation4], 1024  }
  0x12   :  { %426 = vsyncadd [#allocation4], 4294966272  ;;  %v430_v0 = vmov 0.0   ;;  %vm431_vm0 = vmmov 0   ;;  %vm61_vm1 = vcmask 1043456   ;;  %v51_v2 = vld [vmem:[%s534_s1] sm:$0xff]  ;;  %v297_v46 = vstv %s541_s8 }
  0x13   :  { %349 = vmatprep.subr.bf16.mxu1 %v430_v0  ;;  %351 = vmatprep.mubr.msk.bf16.mxu1 %vm431_vm0, %v430_v0  ;;  %v56_v1 = vld [vmem:[%s536_s3] sm:$0xf]  ;;  %v52_v3 = vld [vmem:[%s534_s1 + $0x8] sm:$0xff]  ;;  %vm57_vm2 = vcmask 64512   ;;  %v389_v12 = vld [vmem:[#allocation3 + $0x10] sm:$0xff]   ;;  %vm112_vm3 = vcmask 130048  }
  0x14   :  { %361 = vmatprep.subr.bf16.mxu0 %v430_v0  ;;  %377 = vmatprep.mubr.msk.bf16.mxu0 %vm431_vm0, %v430_v0  ;;  %v63_v4 = vsel %vm61_vm1, %v56_v1, 0  ;;  %v53_v5 = vpack.c.bf16 %v52_v3, %v51_v2  ;;  %v386_v6 = vld [vmem:[%s535_s2] sm:$0xff]   ;;  %v49_v9 = vld [vmem:[%s533_s0 + $0x8] sm:$0xff]  ;;  %v390_v13 = vld [vmem:[#allocation3 + $0x18] sm:$0xff]   ;;  %vm312_vm4 = vcmask 7168  }
  0x15   :  { %350 = vmatpush3.bf16.msra.mxu1 %v63_v4  ;;  %v387_v7 = vld [vmem:[#allocation3] sm:$0xff]   ;;  %v388_v10 = vld [vmem:[#allocation3 + $0x8] sm:$0xff]   ;;  %v393_v16 = vld [vmem:[#allocation3 + $0x30] sm:$0xff]  }
  0x16   :  { %355 = vmatprep.subr.bf16.mxu1 %v430_v0  ;;  %v48_v8 = vld [vmem:[%s533_s0] sm:$0xff]  ;;  %362 = vmatpush3.bf16.msra.mxu0 %v387_v7  ;;  %v392_v15 = vld [vmem:[#allocation3 + $0x28] sm:$0xff]   ;;  %v394_v17 = vld [vmem:[#allocation3 + $0x38] sm:$0xff]  }
  0x17   :  { %363 = vmatprep.subr.bf16.mxu0 %v430_v0  ;;  %v50_v11 = vpack.c.bf16 %v49_v9, %v48_v8  ;;  %v391_v14 = vld [vmem:[#allocation3 + $0x20] sm:$0xff]  }
  0x18   :  { %352 = vmatmul.mubr.msk.bf16.vlgmr.msra.gmra.mrb[0].mxu1 %vm57_vm2, %v53_v5  ;;  %v323_v23 = vld [vmem:[%s537_s4] ss:$0 sm:$0xff] }
  0x19   :  { %356 = vmatpush3.bf16.msra.mxu1 %v386_v6  ;;  %357 = vmatprep.mubr.msk.bf16.mxu1 %vm431_vm0, %v430_v0  ;;  %v324_v34 = vld [vmem:[%s539_s6] ss:$0 sm:$0xff] }
  0x1a   :  { %364 = vmatpush3.bf16.msra.mxu0 %v388_v10  ;;  %v333_v39 = vld [vmem:[%s540_s7] ss:$0 sm:$0xff] }
  0x1b   :  { %365 = vmatprep.subr.bf16.mxu0 %v430_v0 }
  0x1e   :  { %366 = vmatpush3.bf16.msra.mxu0 %v389_v12 }
  0x1f   :  { %367 = vmatprep.subr.bf16.mxu0 %v430_v0 }
  0x20   :  { %358 = vmatmul.mubr.msk.bf16.vlgmr.msra.gmra.mrb[4].mxu1 %vm112_vm3, %v50_v11 }
  0x22   :  { %368 = vmatpush3.bf16.msra.mxu0 %v390_v13 }
  0x23   :  { %369 = vmatprep.subr.bf16.mxu0 %v430_v0 }
  0x26   :  { %370 = vmatpush3.bf16.msra.mxu0 %v391_v14 }
  0x27   :  { %371 = vmatprep.subr.bf16.mxu0 %v430_v0 }
  0x2a   :  { %372 = vmatpush3.bf16.msra.mxu0 %v392_v15 }
  0x2b   :  { %373 = vmatprep.subr.bf16.mxu0 %v430_v0 }
  0x2e   :  { %374 = vmatpush3.bf16.msra.mxu0 %v393_v16 }
  0x2f   :  { %375 = vmatprep.subr.bf16.mxu0 %v430_v0 }
  0x32   :  { %376 = vmatpush3.bf16.msra.mxu0 %v394_v17 }
  0xeb   :  { %v99_v18 = vpop.f32.mrb[0].mxu1 }
  0xec   :  { %v353_v19 = vpop.f32.mrb[1].mxu1 }
  0xed   :  { %v102_v20 = vpop.f32.mrb[2].mxu1 }
  0xee   :  { %v354_v21 = vpop.f32.mrb[3].mxu1 }
  0xf3   :  { %v150_v22 = vpop.f32.mrb[4].mxu1 }
  0xf4   :  { %v151_v24 = vadd.f32 %v150_v22, %v99_v18  ;;  %v359_v25 = vpop.f32.mrb[5].mxu1 }
  0xf5   :  { %v153_v26 = vpop.f32.mrb[6].mxu1 }
  0xf6   :  { %v164_v27 = vadd.f32 %v323_v23, %v151_v24  ;;  %v154_v28 = vadd.f32 %v153_v26, %v102_v20  ;;  %v360_v29 = vpop.f32.mrb[7].mxu1 }
  0xf8   :  { %v165_v30 = vadd.f32 %v323_v23, %v154_v28  ;;  %v166_v31 = vmax.f32 %v164_v27, 0.0 }
  0xfa   :  { %v167_v32 = vmax.f32 %v165_v30, 0.0 }
  0xfc   :  { %v168_v33 = vpack.c.bf16 %v167_v32, %v166_v31 }
  0xfe   :  { %378 = vmatmul.mubr.bf16.vlgmr.msra.gmra.mrb[0].mxu0 %v168_v33 }
 0x1d1   :  { %v274_v35 = vpop.f32.mrb[0].mxu0 }
 0x1d2   :  { %v275_v36 = vadd.f32 %v324_v34, %v274_v35  ;;  %v379_v37 = vpop.f32.mrb[1].mxu0 }
 0x1d3   :  { %v277_v38 = vpop.f32.mrb[2].mxu0 }
 0x1d4   :  { %v281_v40 = vmax.f32 %v275_v36, 0.0  ;;  %v278_v41 = vadd.f32 %v324_v34, %v277_v38  ;;  %v380_v42 = vpop.f32.mrb[3].mxu0 }
 0x1d6   :  { %v282_v43 = vmax.f32 %v278_v41, 0.0  ;;  %v290_v44 = vmul.f32 %v333_v39, %v281_v40 }
 0x1d8   :  { %292 = vadd.xlane.f32.xlu0 %v290_v44  ;;  %v291_v45 = vmul.f32 %v333_v39, %v282_v43 }
 0x1dc   :  { %294 = vadd.xlane.f32.xlu0 %v291_v45 }
 0x265   :  { %v293_v47 = vpop.xlane.xlu0 %292 }
 0x266   :  { %v298_v48 = vadd.f32 %v297_v46, %v293_v47 }
 0x268   :  { %v334_v49 = vmul.f32 -1.442695, %v298_v48 }
 0x269   :  { %v295_v50 = vpop.xlane.xlu0 %294 }
 0x26a   :  { %395 = vpow2.f32 %v334_v49  ;;  %v299_v51 = vadd.f32 %v297_v46, %v295_v50 }
 0x26c   :  { %v335_v52 = vmul.f32 -1.442695, %v299_v51 }
 0x26e   :  { %397 = vpow2.f32 %v335_v52 }
 0x274   :  { %v396_v53 = vpop.eup %395 }
 0x275   :  { %v306_v54 = vadd.f32 1.0, %v396_v53 }
 0x277   :  { %399 = vrcp.f32 %v306_v54 }
 0x278   :  { %v398_v55 = vpop.eup %397 }
 0x279   :  { %v307_v56 = vadd.f32 1.0, %v398_v55 }
 0x27b   :  { %401 = vrcp.f32 %v307_v56 }
 0x281   :  { %v400_v57 = vpop.eup %399 }
 0x282   :  { %313 = vst.msk [vmem:[%s542_s9] sm:$0xff] %vm312_vm4, %v400_v57 }
 0x285   :  { %v402_v58 = vpop.eup %401 }
 0x286   :  { %314 = vst.msk [vmem:[%s542_s9 + $0x8] sm:$0xff] %vm312_vm4, %v402_v58 }
 0x287   :  { %319 = vsyncpa [#allocation4], 1 }

</bundles_post_ra>
